<compile_context>
chip_gen: v7x
topology: tpu7x:2x2x1
jax: 0.10.0
libtpu: 0.0.40
codegen_flags: <defaults>
</compile_context>

<pallas_src>
import numpy as np
import jax
import jax.numpy as jnp
from jax.experimental import pallas as pl
from jax.experimental.pallas import tpu as pltpu

NUM_LAYERS = 4


def _cdiv(a, b):
    return -(-a // b)


def _round_up(a, m):
    return _cdiv(a, m) * m


# ----------------------------------------------------------------------------
# Pallas kernel: one (batch-tile, stage) grid step of the full forward
# ----------------------------------------------------------------------------
def sparse_odenet_kernel(x_ref, w_ref, hp_ref, out_ref):
    """x_ref  : (tile, Dp)   lane-packed batch tile (G samples per row)
       w_ref  : (L, Dp, Dp)  block-diag masked W^T stacks, VMEM-resident
       hp_ref : (2L, Dp)     rows [0,L)  = per-layer gate  = sigmoid(hgw*t+hgb)
                             rows [L,2L) = per-layer shift = b_eff*gate + hbw*t
                             (all t-dependence precomputed in the wrapper)
       out_ref: (tile, Dp)
    """
    L = w_ref.shape[0]
    hp = hp_ref[...]                                  # one (8,128) vreg for L=4

    def csq(l, h):
        # ConcatSquashLinearSparse: (h @ Wmask^T) * gate + (b*gate + hyper_bias)
        res = jnp.dot(h.astype(w_ref.dtype), w_ref[l],
                      preferred_element_type=jnp.float32)
        return res * hp[l:l + 1, :] + hp[L + l:L + l + 1, :]

    # layer 0: concat([x, t]) handled by folding the t-column into the shift
    h = jnp.tanh(csq(0, x_ref[...]))
    # middle layers: tanh residual (static unroll, L=4)
    for l in range(1, L - 1):
        h = jnp.tanh(csq(l, h)) + h
    # last layer: no activation, no residual
    out_ref[...] = csq(L - 1, h)


# ----------------------------------------------------------------------------
# Batch planning / lane packing helpers (packed layout can be kept across an
# entire ODE solve; unpack once at the end)
# ----------------------------------------------------------------------------
def _plan_batch(B, G, requested_tile):
    """Pick the batch tile (packed rows) and the padded packed-row count."""
    rows = _cdiv(B, G)
    rows8 = _round_up(rows, 8)
    tile = min(_round_up(max(requested_tile, 8), 8), rows8)
    # v7x: prefer >= 2 grid steps along the parallel batch axis when possible
    if rows8 >= 16 and _cdiv(rows8, tile) < 2:
        tile = _round_up(_cdiv(rows8, 2), 8)
    rows_p = _round_up(rows8, tile)
    return tile, rows_p


def pack_batch(xs, G, rows_p):
    """(S, B, D) -> lane-packed (S, rows_p, G*D)."""
    S, B, D = xs.shape
    pad = rows_p * G - B
    xp = jnp.pad(xs, ((0, 0), (0, pad), (0, 0))) if pad else xs
    return xp.reshape(S, rows_p, G * D)


def unpack_batch(out_packed, G, B, D):
    S, rows_p, _ = out_packed.shape
    return out_packed.reshape(S, rows_p * G, D)[:, :B]


def build_hyper_params(ts, kparams):
    """Per-stage, batch-independent hyper-net math, merged into one array.

    Returns (S, 2L, Dp):  rows [0,L) = gate,  rows [L,2L) = shift, where
      gate  = sigmoid(hg_w*t + hg_b)
      shift = (b + [l==0] * t*w0_t_col) * gate + hb_w*t
    """
    _, w0t, b, hgw, hgb, hbw = kparams
    ts = jnp.asarray(ts, jnp.float32).reshape(-1, 1, 1)            # (S,1,1)
    gate = jax.nn.sigmoid(hgw[None] * ts + hgb[None])              # (S,L,Dp)
    b_eff = jnp.broadcast_to(b[None], gate.shape)
    b_eff = b_eff.at[:, 0, :].add(ts[:, :, 0] * w0t[None])         # fold t col
    shift = b_eff * gate + hbw[None] * ts                          # (S,L,Dp)
    return jnp.concatenate([gate, shift], axis=1)                  # (S,2L,Dp)


# ----------------------------------------------------------------------------
# pallas_call wrappers
# ----------------------------------------------------------------------------
def sparse_odenet_forward_packed(ts, x_packed, kparams, batch_tile):
    """Fused S-stage forward on an already lane-packed (S, rows_p, Dp) batch."""
    W = kparams[0]
    L, Dp, _ = W.shape
    S, rows_p, _ = x_packed.shape
    assert rows_p % batch_tile == 0
    nb = rows_p // batch_tile
    hp = build_hyper_params(ts, kparams)                           # (S, 2L, Dp)

    return pl.pallas_call(
        sparse_odenet_kernel,
        out_shape=jax.ShapeDtypeStruct((S, rows_p, Dp), jnp.float32),
        grid=(nb, S),
        in_specs=[
            pl.BlockSpec((None, batch_tile, Dp), lambda i, s: (s, i, 0)),  # x
            pl.BlockSpec((L, Dp, Dp),            lambda i, s: (0, 0, 0)),  # W (resident)
            pl.BlockSpec((None, 2 * L, Dp),      lambda i, s: (s, 0, 0)),  # gate/shift
        ],
        out_specs=pl.BlockSpec((None, batch_tile, Dp), lambda i, s: (s, i, 0)),
        compiler_params=pltpu.CompilerParams(
            dimension_semantics=("parallel", "arbitrary")),   # batch tiles || stages seq
    )(x_packed, W, hp)


def sparse_odenet_forward_stages(ts, xs, kparams, *, batch_tile=512):
    """ts: (S,), xs: (S, B, D) — S fused evaluations in one pallas_call."""
    W = kparams[0]
    _, Dp, _ = W.shape
    S, B, D = xs.shape
    G = Dp // D
    tile, rows_p = _plan_batch(B, G, batch_tile)
    x_packed = pack_batch(xs, G, rows_p)
    out_packed = sparse_odenet_forward_packed(ts, x_packed, kparams, tile)
    return unpack_batch(out_packed, G, B, D)


def sparse_odenet_forward(t, x, kparams, *, batch_tile=512):
    """Single-evaluation convenience wrapper (one t, one batch)."""
    ts = jnp.asarray(t, jnp.float32).reshape(1)
    return sparse_odenet_forward_stages(ts, x[None], kparams,
                                        batch_tile=batch_tile)[0]


# ----------------------------------------------------------------------------
# Deterministic parameter construction (mirrors nn.Linear shapes in __init__)
# ----------------------------------------------------------------------------
def init_raw_params(key, dims, num_layers=NUM_LAYERS):
    """Per-layer raw params: (weight(D,din), bias(D,), hb_w(D,1), hg_w(D,1), hg_b(D,))."""
    D = dims
    dims_in = [D + 1] + [D] * (num_layers - 1)
    raw = []
    for l in range(num_layers):
        din = dims_in[l]
        k = jax.random.fold_in(key, l)
        k1, k2, k3, k4, k5 = jax.random.split(k, 5)
        bound = 1.0 / np.sqrt(din)
        weight = jax.random.uniform(k1, (D, din), jnp.float32, -bound, bound)
        bias = jax.random.uniform(k2, (D,), jnp.float32, -bound, bound)
        hb_w = jax.random.uniform(k3, (D, 1), jnp.float32, -1.0, 1.0)
        hg_w = jax.random.uniform(k4, (D, 1), jnp.float32, -1.0, 1.0)
        hg_b = jax.random.uniform(k5, (D,), jnp.float32, -1.0, 1.0)
        raw.append((weight, bias, hb_w, hg_w, hg_b))
    return raw


def pack_kernel_params(raw, adjacency, dims, num_layers=NUM_LAYERS,
                       lane_pack=None, weight_dtype=jnp.float32):
    """Mask, transpose, lane-pack (block-diag) and stack params for the kernel.

    weight_dtype=jnp.bfloat16 is the v6e/v7x option once the f32 tolerance is
    relaxed; keep f32 on v5e (no bf16 VPU/EUP) and for the 1e-5 check here.
    """
    D = dims
    if lane_pack is None:
        # kron block-diag lane packing is a small-D trick only (review): at
        # D >= 128 use the plain (D,D) weight and no packing.
        lane_pack = 128 // D if (D < 128 and 128 % D == 0) else 1
    G = lane_pack
    a0, a1 = adjacency.shape
    eye_g = jnp.eye(G, dtype=jnp.float32)

    W_stack, b_stack, hgw_stack, hgb_stack, hbw_stack = [], [], [], [], []
    w0t = None
    for l, (weight, bias, hb_w, hg_w, hg_b) in enumerate(raw):
        din = weight.shape[1]
        mask = jnp.zeros((D, din), jnp.float32).at[:a0, :a1].set(adjacency)
        w_eff_t = (mask * weight).T                       # (din, D): h @ W^T
        if l == 0:
            w_core = w_eff_t[:D, :]                       # (D, D)
            w0t = jnp.tile(w_eff_t[D, :], (G,))           # (G*D,) t-feature row
        else:
            w_core = w_eff_t                              # (D, D)
        W_stack.append(jnp.kron(eye_g, w_core))           # (G*D, G*D) block-diag
        b_stack.append(jnp.tile(bias, (G,)))
        hgw_stack.append(jnp.tile(hg_w[:, 0], (G,)))
        hgb_stack.append(jnp.tile(hg_b, (G,)))
        hbw_stack.append(jnp.tile(hb_w[:, 0], (G,)))

    return (jnp.stack(W_stack).astype(weight_dtype),      # (L, G*D, G*D)
            w0t,                                          # (G*D,)
            jnp.stack(b_stack),                           # (L, G*D)
            jnp.stack(hgw_stack),                         # (L, G*D)
            jnp.stack(hgb_stack),                         # (L, G*D)
            jnp.stack(hbw_stack))                         # (L, G*D)


# ----------------------------------------------------------------------------
# Pure-JAX reference (direct transcription of the PyTorch forward)
# ----------------------------------------------------------------------------
def ref_forward(t, x, adjacency, raw, num_layers=NUM_LAYERS):
    B, D = x.shape
    a0, a1 = adjacency.shape
    dx = jnp.concatenate([x, t * jnp.ones((B, 1), x.dtype)], axis=1)
    for l, (weight, bias, hb_w, hg_w, hg_b) in enumerate(raw):
        din = weight.shape[1]
        mask = jnp.zeros((D, din), jnp.float32).at[:a0, :a1].set(adjacency)
        w = mask * weight
        res = dx @ w.T + bias
        gate = jax.nn.sigmoid(hg_w[:, 0] * t + hg_b)      # (D,)
        hbias = hb_w[:, 0] * t                            # (D,)
        acti = res * gate + hbias
        if l < num_layers - 1:
            if l == 0:
                dx = jnp.tanh(acti)
            else:
                dx = jnp.tanh(acti) + dx
        else:
            dx = acti
    return dx


# ----------------------------------------------------------------------------
if __name__ == "__main__":
    # TODO(synk): the ODE solver's time-stepping loop itself lives outside this
    # module's forward; here the RK-style stage evaluations are fused into one
    # pallas_call (stage grid axis) which is as far as the forward can go.
    B, D = 32, 32          # B=32 -> 4 lane-packed samples fill (8, 128) exactly
    S = 4                  # number of fused stage evaluations (distinct t, x)
    key = jax.random.PRNGKey(0)
    kx, kp = jax.random.split(key)

    xs = jax.random.normal(kx, (S, B, D), jnp.float32)          # per-stage states
    ts = jnp.asarray([0.0, 0.37, 0.37, 0.74], jnp.float32)      # per-stage times

    # deterministic lower-triangular adjacency (autoregressive structure)
    adjacency = jnp.asarray(np.tril(np.ones((D, D), np.float32)))

    raw = init_raw_params(kp, D)
    kparams = pack_kernel_params(raw, adjacency, D)

    # fused multi-stage forward (single pallas_call, weights resident)
    outs = jax.block_until_ready(sparse_odenet_forward_stages(ts, xs, kparams))
    for s in range(S):
        ref = ref_forward(ts[s], xs[s], adjacency, raw)
        np.testing.assert_allclose(np.asarray(outs[s]), np.asarray(ref),
                                   rtol=1e-5, atol=1e-5)

    # single-evaluation convenience path
    out1 = jax.block_until_ready(sparse_odenet_forward(0.37, xs[1], kparams))
    ref1 = ref_forward(jnp.float32(0.37), xs[1], adjacency, raw)
    np.testing.assert_allclose(np.asarray(out1), np.asarray(ref1),
                               rtol=1e-5, atol=1e-5)

    print("KERNEL_OK")
</pallas_src>

<mosaic_0001>
module attributes {stable_mosaic.version = 11 : i64} {
  func.func @sparse_odenet_kernel(%arg0: i32, %arg1: i32, %arg2: memref<1x8x128xf32, #tpu.memory_space<vmem>>, %arg3: memref<4x128x128xf32, #tpu.memory_space<vmem>>, %arg4: memref<1x8x128xf32, #tpu.memory_space<vmem>>, %arg5: memref<1x8x128xf32, #tpu.memory_space<vmem>>) attributes {dimension_semantics = [#tpu.dimension_semantics<parallel>, #tpu.dimension_semantics<arbitrary>], iteration_bounds = array<i64: 1, 4>, scalar_prefetch = 0 : i64, scratch_operands = 0 : i64, tpu.core_type = #tpu.core_type<tc>, window_params = [{transform_indices = @transform_0, window_bounds = array<i64: 1, 8, 128>}, {pipeline_mode = #tpu.pipeline_mode<synchronous>, transform_indices = @transform_1, window_bounds = array<i64: 4, 128, 128>}, {transform_indices = @transform_2, window_bounds = array<i64: 1, 8, 128>}, {transform_indices = @transform_3, window_bounds = array<i64: 1, 8, 128>}]} {
    %c0 = arith.constant 0 : index
    %c0_0 = arith.constant 0 : index
    %c0_1 = arith.constant 0 : index
    %0 = vector.load %arg4[%c0, %c0_0, %c0_1] : memref<1x8x128xf32, #tpu.memory_space<vmem>>, vector<1x8x128xf32>
    %1 = vector.shape_cast %0 : vector<1x8x128xf32> to vector<8x128xf32>
    %c0_2 = arith.constant 0 : index
    %c0_3 = arith.constant 0 : index
    %c0_4 = arith.constant 0 : index
    %2 = vector.load %arg2[%c0_2, %c0_3, %c0_4] : memref<1x8x128xf32, #tpu.memory_space<vmem>>, vector<1x8x128xf32>
    %3 = vector.shape_cast %2 : vector<1x8x128xf32> to vector<8x128xf32>
    %c0_5 = arith.constant 0 : index
    %c0_6 = arith.constant 0 : index
    %c0_7 = arith.constant 0 : index
    %4 = vector.load %arg3[%c0_5, %c0_6, %c0_7] : memref<4x128x128xf32, #tpu.memory_space<vmem>>, vector<1x128x128xf32>
    %5 = vector.shape_cast %4 : vector<1x128x128xf32> to vector<128x128xf32>
    %cst = arith.constant dense<0.000000e+00> : vector<8x128xf32>
    %6 = tpu.matmul %3, %5, %cst {dimension_numbers = #tpu.dot_dimension_numbers<[1], [0], [0], [1], [0, 0, 1, 1], [], []>} : vector<8x128xf32>, vector<128x128xf32>, vector<8x128xf32> -> vector<8x128xf32>
    %7 = vector.extract_strided_slice %1 {offsets = [0, 0], sizes = [1, 128], strides = [1, 1]} : vector<8x128xf32> to vector<1x128xf32>
    %8 = vector.broadcast %7 : vector<1x128xf32> to vector<8x128xf32>
    %9 = arith.mulf %6, %8 : vector<8x128xf32>
    %10 = vector.extract_strided_slice %1 {offsets = [4, 0], sizes = [1, 128], strides = [1, 1]} : vector<8x128xf32> to vector<1x128xf32>
    %11 = vector.broadcast %10 : vector<1x128xf32> to vector<8x128xf32>
    %12 = arith.addf %9, %11 : vector<8x128xf32>
    %13 = math.tanh %12 : vector<8x128xf32>
    %c1 = arith.constant 1 : index
    %c0_8 = arith.constant 0 : index
    %c0_9 = arith.constant 0 : index
    %14 = vector.load %arg3[%c1, %c0_8, %c0_9] : memref<4x128x128xf32, #tpu.memory_space<vmem>>, vector<1x128x128xf32>
    %15 = vector.shape_cast %14 : vector<1x128x128xf32> to vector<128x128xf32>
    %cst_10 = arith.constant dense<0.000000e+00> : vector<8x128xf32>
    %16 = tpu.matmul %13, %15, %cst_10 {dimension_numbers = #tpu.dot_dimension_numbers<[1], [0], [0], [1], [0, 0, 1, 1], [], []>} : vector<8x128xf32>, vector<128x128xf32>, vector<8x128xf32> -> vector<8x128xf32>
    %17 = vector.extract_strided_slice %1 {offsets = [1, 0], sizes = [1, 128], strides = [1, 1]} : vector<8x128xf32> to vector<1x128xf32>
    %18 = vector.broadcast %17 : vector<1x128xf32> to vector<8x128xf32>
    %19 = arith.mulf %16, %18 : vector<8x128xf32>
    %20 = vector.extract_strided_slice %1 {offsets = [5, 0], sizes = [1, 128], strides = [1, 1]} : vector<8x128xf32> to vector<1x128xf32>
    %21 = vector.broadcast %20 : vector<1x128xf32> to vector<8x128xf32>
    %22 = arith.addf %19, %21 : vector<8x128xf32>
    %23 = math.tanh %22 : vector<8x128xf32>
    %24 = arith.addf %23, %13 : vector<8x128xf32>
    %c2 = arith.constant 2 : index
    %c0_11 = arith.constant 0 : index
    %c0_12 = arith.constant 0 : index
    %25 = vector.load %arg3[%c2, %c0_11, %c0_12] : memref<4x128x128xf32, #tpu.memory_space<vmem>>, vector<1x128x128xf32>
    %26 = vector.shape_cast %25 : vector<1x128x128xf32> to vector<128x128xf32>
    %cst_13 = arith.constant dense<0.000000e+00> : vector<8x128xf32>
    %27 = tpu.matmul %24, %26, %cst_13 {dimension_numbers = #tpu.dot_dimension_numbers<[1], [0], [0], [1], [0, 0, 1, 1], [], []>} : vector<8x128xf32>, vector<128x128xf32>, vector<8x128xf32> -> vector<8x128xf32>
    %28 = vector.extract_strided_slice %1 {offsets = [2, 0], sizes = [1, 128], strides = [1, 1]} : vector<8x128xf32> to vector<1x128xf32>
    %29 = vector.broadcast %28 : vector<1x128xf32> to vector<8x128xf32>
    %30 = arith.mulf %27, %29 : vector<8x128xf32>
    %31 = vector.extract_strided_slice %1 {offsets = [6, 0], sizes = [1, 128], strides = [1, 1]} : vector<8x128xf32> to vector<1x128xf32>
    %32 = vector.broadcast %31 : vector<1x128xf32> to vector<8x128xf32>
    %33 = arith.addf %30, %32 : vector<8x128xf32>
    %34 = math.tanh %33 : vector<8x128xf32>
    %35 = arith.addf %34, %24 : vector<8x128xf32>
    %c3 = arith.constant 3 : index
    %c0_14 = arith.constant 0 : index
    %c0_15 = arith.constant 0 : index
    %36 = vector.load %arg3[%c3, %c0_14, %c0_15] : memref<4x128x128xf32, #tpu.memory_space<vmem>>, vector<1x128x128xf32>
    %37 = vector.shape_cast %36 : vector<1x128x128xf32> to vector<128x128xf32>
    %cst_16 = arith.constant dense<0.000000e+00> : vector<8x128xf32>
    %38 = tpu.matmul %35, %37, %cst_16 {dimension_numbers = #tpu.dot_dimension_numbers<[1], [0], [0], [1], [0, 0, 1, 1], [], []>} : vector<8x128xf32>, vector<128x128xf32>, vector<8x128xf32> -> vector<8x128xf32>
    %39 = vector.extract_strided_slice %1 {offsets = [3, 0], sizes = [1, 128], strides = [1, 1]} : vector<8x128xf32> to vector<1x128xf32>
    %40 = vector.broadcast %39 : vector<1x128xf32> to vector<8x128xf32>
    %41 = arith.mulf %38, %40 : vector<8x128xf32>
    %42 = vector.extract_strided_slice %1 {offsets = [7, 0], sizes = [1, 128], strides = [1, 1]} : vector<8x128xf32> to vector<1x128xf32>
    %43 = vector.broadcast %42 : vector<1x128xf32> to vector<8x128xf32>
    %44 = arith.addf %41, %43 : vector<8x128xf32>
    %c0_17 = arith.constant 0 : index
    %c0_18 = arith.constant 0 : index
    %c0_19 = arith.constant 0 : index
    %45 = vector.load %arg5[%c0_17, %c0_18, %c0_19] : memref<1x8x128xf32, #tpu.memory_space<vmem>>, vector<1x8x128xf32>
    %46 = vector.shape_cast %45 : vector<1x8x128xf32> to vector<8x128xf32>
    %47 = vector.shape_cast %44 : vector<8x128xf32> to vector<1x8x128xf32>
    tpu.vector_store %arg5[%c0_17, %c0_18, %c0_19], %47 {strides = array<i32>} : memref<1x8x128xf32, #tpu.memory_space<vmem>>, vector<1x8x128xf32>,
    return
  }
  func.func @transform_0(%arg0: i32, %arg1: i32) -> (i32, i32, i32) {
    %c0_i32 = arith.constant 0 : i32
    %c0_i32_0 = arith.constant 0 : i32
    return %arg1, %arg0, %c0_i32 : i32, i32, i32
  }
  func.func @transform_1(%arg0: i32, %arg1: i32) -> (i32, i32, i32) {
    %c0_i32 = arith.constant 0 : i32
    %c0_i32_0 = arith.constant 0 : i32
    %c0_i32_1 = arith.constant 0 : i32
    %c0_i32_2 = arith.constant 0 : i32
    return %c0_i32, %c0_i32_0, %c0_i32_1 : i32, i32, i32
  }
  func.func @transform_2(%arg0: i32, %arg1: i32) -> (i32, i32, i32) {
    %c0_i32 = arith.constant 0 : i32
    %c0_i32_0 = arith.constant 0 : i32
    %c0_i32_1 = arith.constant 0 : i32
    return %arg1, %c0_i32, %c0_i32_0 : i32, i32, i32
  }
  func.func @transform_3(%arg0: i32, %arg1: i32) -> (i32, i32, i32) {
    %c0_i32 = arith.constant 0 : i32
    %c0_i32_0 = arith.constant 0 : i32
    return %arg1, %arg0, %c0_i32 : i32, i32, i32
  }
}

</mosaic_0001>

<bundles_post_ra>
// kernel: tpu_custom_call.1
= control target key start
LH: loop header
LB: loop body
LE: loop exit
PB: predicated region body
PF: predicated region fallthrough
CT: control target
= control target key end

     0   :  { %s1715_s0 = inlined_call_operand.hbm [shape: f32[4,8,128], index: 0, kind: input, shape index: {}]   ;;  %s1716_s1 = inlined_call_operand.hbm [shape: f32[4,128,128], index: 1, kind: input, shape index: {}]   ;;  %s1717_s2 = inlined_call_operand.hbm [shape: f32[4,8,128], index: 2, kind: input, shape index: {}]   ;;  %s1718_s3 = inlined_call_operand.hbm [shape: f32[4,8,128], index: 3, kind: output, shape index: {}]  }
   0x1   :  { %1724 = sst [smem:[#allocation13_spill]] %s1715_s0 }
   0x2   :  { %8 = vsyncpa [#allocation3], 0 }
   0x3   :  { %10 = vsyncpa [#allocation3 + $0x1], 0 }
   0x4   :  { %11 = vsyncpa [#allocation6], 0 }
   0x5   :  { %12 = vsyncpa [#allocation4], 0 }
   0x6   :  { %14 = vsyncpa [#allocation4 + $0x1], 0  ;;  %s1392_s12 = smov 0   ;;  %s1394_s13 = smov 0  }
   0x7   :  { %s1396_s14 = smov 0   ;;  %s1398_s15 = smov 0  }
   0x8   :  { %s1400_s16 = smov 0   ;;  %s1402_s17 = smov 0  }
   0x9 LB: > { %s29_s18 = sadd.s32 1, %s1357_s16  ;;  %s41_s19 = sadd.s32 1, %s1349_s14  ;;  %s1361_s17 = sphi %s1402_s17, %s20_s17   ;;  %s1357_s16 = sphi %s1400_s16, %s1743_s16   ;;  %s1353_s15 = sphi %s1398_s15, %s1742_s15   ;;  %s1349_s14 = sphi %s1396_s14, %s1741_s14   ;;  %s1345_s13 = sphi %s1394_s13, %s1740_s13   ;;  %s1341_s12 = sphi %s1392_s12, %s1739_s12  }
   0xa   : > { %p30_p0 = scmp.ge.s32.totalorder %s29_s18, 4  ;;  %p48_p1 = scmp.ne.s32.totalorder %s1349_s14, %s1345_s13 }
   0xb   : > { %p49_p2 = scmp.eq.s32.totalorder %s1361_s17, 0  ;;  %p1120_p4 = scmp.lt.s32.totalorder %s1361_s17, 4 }
   0xc   : > { %s1745_s18 = smov (%p30_p0, %s29_s18), 0  ;;  %s166_s21 = sand.u32 1, %s1361_s17  }
   0xd   : > { %p50_p3 = por %p49_p2, %p48_p1  ;;  %s36_s20 = ssub.s32 %s1357_s16, %s1745_s18 }
   0xe   : > { %p39_p5 = scmp.eq.s32.totalorder %s36_s20, 0  ;;  %s168_s22 = sand.u32 1, %s1349_s14  }
   0xf   : > { %s778_s23 = sshll.u32 %s1357_s16, 7  ;;  %s1441_s25 = sshll.u32 %s168_s22, 3 }
  0x10   : > { %s1439_s24 = scalar_select %p39_p5, %s1349_s14, %s41_s19  }
  0x11   : > { %s1725_s0 = sld [smem:[#allocation13_spill]]  ;;  %p1450_p6 = pnand %p1120_p4, %p50_p3 }
  0x12   : > { %s170_s30 = scalar_lea.vmem [#allocation2], %s1441_s25  ;;  %s1457_s5 = scalar_lea.sflag [#allocation3], %s166_s21 }
  0x13   : > { %s178_s4 = sshll.u32 %s170_s30, 4  ;;  %p1185_p8 = pneg %p1450_p6  ;;  %s1455_s4 = int_to_ptr.vmem [resolvable:$true] %s178_s4 }
  0x17   : > { %s1448_s28 = scalar_lea.hbm %s1725_s0, %s778_s23  ;;  %s1188_s9 = scalar_lea.hbm %s1725_s0, 512 }
  0x18   : > { %s1183_s6 = scalar_lea.hbm %s1448_s28, 128  ;;  %p1189_p11 = scmp.lt.u32.totalorder %s1448_s28, %s1725_s0 }
  0x19   : > { %p1184_p7 = scmp.ne.s32.totalorder %s1448_s28, %s1183_s6  ;;  %p1190_p12 = scmp.lt.u32.totalorder %s1188_s9, %s1183_s6 }
  0x1a   : > { %p1192_p0 = scmp.lt.u32.totalorder %s1183_s6, %s1448_s28 }
  0x1b   : > { %p1186_p9 = pnand %p1185_p8, %p1184_p7  ;;  %p1191_p13 = por %p1190_p12, %p1189_p11 }
  0x1d   : > { %p1187_p10 = pneg %p1186_p9  ;;  %p1193_p2 = por %p1192_p0, %p1191_p13 }
  0x1f   : > { %p1194_p3 = pnand %p1193_p2, %p1187_p10 }
  0x21   : > { %1197 = shalt.err (!%p1194_p3)
}
  0x22   : > { %s1198_s19 = scalar_lea.vmem %s1455_s4, 128  ;;  %s1363_s20 = smov [#allocation2]  }
  0x23   : > { %p1199_p4 = scmp.ne.s32.totalorder %s1455_s4, %s1198_s19  ;;  %s1203_s21 = sshll.u32 %s1363_s20, 4  ;;  %s1204_s21 = int_to_ptr.vmem [resolvable:$false] %s1203_s21 }
  0x24   : > { %s1205_s22 = scalar_lea.vmem %s1204_s21, 256  ;;  %p1206_p9 = scmp.lt.s32.totalorder %s1455_s4, %s1204_s21 }
  0x25   : > { %p1201_p5 = pnand %p1199_p4, %p1185_p8  ;;  %p1207_p11 = scmp.lt.s32.totalorder %s1205_s22, %s1198_s19 }
  0x27   : > { %p1202_p7 = pneg %p1201_p5  ;;  %p1208_p12 = por %p1207_p11, %p1206_p9 }
  0x29   : > { %p1209_p13 = pnand %p1208_p12, %p1202_p7 }
  0x2b   : > { %1212 = shalt.err (!%p1209_p13)
}
  0x2c   : > { %1111 = dma.hbm_to_vmem [thread:$0]  (!%p1450_p6), %s1448_s28, 128, %s1455_s4, %s1457_s5  }
  0x2d   : > { %s1486_s26 = sadd.s32 4294967295, %s1361_s17   ;;  %s773_s27 = sadd.s32 4294967294, %s1361_s17  }
  0x2e   : > { %p54_p10 = scmp.ne.s32.totalorder %s1345_s13, %s1341_s12  ;;  %p1719_p0 = scmp.eq.s32.totalorder %s1486_s26, 0 }
  0x2f   : > { %p127_p2 = scmp.eq.s32.totalorder %s1486_s26, 3  ;;  %p133_p3 = scmp.eq.s32.totalorder %s773_s27, 3 }
  0x30   : > { %p774_p4 = scmp.ge.s32.totalorder %s1361_s17, 1  ;;  %p1496_p5 = por %p1719_p0, %p54_p10 }
  0x31   : > { %p1503_p7 = por %p127_p2, %p48_p1  ;;  %p1507_p9 = por %p133_p3, %p54_p10 }
  0x32   : > { %s1727_s30 = scalar_select %p1496_p5, 1, 0 }
  0x33   : > { %s1728_s28 = scalar_select %p1503_p7, 1, 0 }
  0x34   : > { %s1729_s4 = scalar_select %p1507_p9, 1, 0 }
  0x35   : > { %p140_p11 = scmp.lt.s32.totalorder %s1361_s17, 5  ;;  %s1364_s7 = smov [#allocation5]  }
  0x36   : > { %s152_s8 = sshll.u32 %s1364_s7, 4  ;;  %s1521_s11 = scalar_lea.hbm %s1717_s2, %s778_s23  ;;  %s1523_s8 = int_to_ptr.vmem [resolvable:$true] %s152_s8 }
  0x37   : > { %p1512_p12 = pnand %p774_p4, %p140_p11  ;;  %s189_s19 = scalar_lea.vmem [#allocation7], %s1441_s25 }
  0x38   : > { %s196_s20 = sshll.u32 %s189_s19, 4  ;;  %s1213_s22 = scalar_lea.hbm %s1521_s11, 128  ;;  %s197_s20 = int_to_ptr.vmem [resolvable:$true] %s196_s20 }
  0x39   : > { %s1730_s6 = scalar_select %p1512_p12, 1, 0 }
  0x3a   : > { %p1104_p1 = pneg %p1512_p12  ;;  %p1214_p10 = scmp.ne.s32.totalorder %s1521_s11, %s1213_s22 }
  0x3b   : > { %s1218_s7 = scalar_lea.hbm %s1717_s2, 512  ;;  %p1219_p4 = scmp.lt.u32.totalorder %s1521_s11, %s1717_s2 }
  0x3c   : > { %p1530_p13 = pnand %p1104_p1, %p1719_p0  ;;  %p1216_p2 = pnand %p1214_p10, %p1185_p8 }
  0x3d   : > { %p1220_p11 = scmp.lt.u32.totalorder %s1218_s7, %s1213_s22  ;;  %p1222_p0 = scmp.lt.u32.totalorder %s1213_s22, %s1521_s11 }
  0x3e   : > { %s1731_s21 = scalar_select %p1530_p13, 1, 0 }
  0x3f   : > { %p1217_p3 = pneg %p1216_p2  ;;  %p1221_p1 = por %p1220_p11, %p1219_p4 }
  0x41   : > { %p1223_p9 = por %p1222_p0, %p1221_p1 }
  0x43   : > { %p1224_p7 = pnand %p1223_p9, %p1217_p3 }
  0x45   : > { %1227 = shalt.err (!%p1224_p7)
}
  0x46   : > { %s1228_s25 = scalar_lea.vmem %s197_s20, 128  ;;  %s1365_s19 = smov [#allocation7]  }
  0x47   : > { %p1229_p5 = scmp.ne.s32.totalorder %s197_s20, %s1228_s25  ;;  %s1233_s23 = sshll.u32 %s1365_s19, 4  ;;  %s1234_s23 = int_to_ptr.vmem [resolvable:$false] %s1233_s23 }
  0x48   : > { %s1235_s27 = scalar_lea.vmem %s1234_s23, 256  ;;  %p1236_p12 = scmp.lt.s32.totalorder %s197_s20, %s1234_s23 }
  0x49   : > { %p1231_p10 = pnand %p1229_p5, %p1185_p8  ;;  %p1237_p13 = scmp.lt.s32.totalorder %s1235_s27, %s1228_s25 }
  0x4b   : > { %p1232_p2 = pneg %p1231_p10  ;;  %p1238_p4 = por %p1237_p13, %p1236_p12 }
  0x4d   : > { %p1239_p11 = pnand %p1238_p4, %p1232_p2 }
  0x4f   : > { %1242 = shalt.err (!%p1239_p11)
}
  0x50   : > { %1114 = dma.hbm_to_vmem [thread:$0]  (!%p1450_p6), %s1521_s11, 128, %s197_s20, %s1457_s5  }
  0x51   : > { %s1243_s9 = scalar_lea.hbm %s1716_s1, 8192  ;;  %p1732_p0 = scmp.ne.s32.totalorder %s1731_s21, 0 }
  0x52   : > { %p1244_p8 = scmp.ne.s32.totalorder %s1716_s1, %s1243_s9  ;;  %p1250_p12 = scmp.lt.u32.totalorder %s1243_s9, %s1716_s1 }
  0x53   : > { %p1245_p5 = pneg %p1732_p0 }
  0x55   : > { %p1246_p7 = pnand %p1245_p5, %p1244_p8 }
  0x57   : > { %p1247_p9 = pneg %p1246_p7 }
  0x59   : > { %p1252_p13 = pnand %p1250_p12, %p1247_p9 }
  0x5b   : > { %1255 = shalt.err (!%p1252_p13)
}
  0x5c   : > { %s1256_s29 = scalar_lea.vmem %s1523_s8, 8192  ;;  %p1264_p10 = scmp.lt.s32.totalorder %s1523_s8, %s1523_s8 }
  0x5d   : > { %p1257_p6 = scmp.ne.s32.totalorder %s1523_s8, %s1256_s29  ;;  %p1265_p2 = scmp.lt.s32.totalorder %s1256_s29, %s1256_s29 }
  0x5f   : > { %p1259_p3 = pnand %p1257_p6, %p1245_p5  ;;  %p1266_p4 = por %p1265_p2, %p1264_p10 }
  0x61   : > { %p1260_p1 = pneg %p1259_p3 }
  0x63   : > { %p1267_p11 = pnand %p1266_p4, %p1260_p1 }
  0x65   : > { %1270 = shalt.err (!%p1267_p11)
}
  0x66   : > { %s1366_s0 = smov 128   ;;  %s1367_s5 = smov 8  }
  0x67   : > { %1107 = dma.hbm_to_vmem [thread:$0]  (!%p1732_p0), %s1716_s1, 8192, %s1523_s8, [#allocation6], %s1366_s0, %s1366_s0, %s1367_s5  }
  0x68   : > { %p1733_p8 = scmp.ne.s32.totalorder %s1730_s6, 0 }
  0x69   : > { %s207_s23 = sand.u32 (!%p1733_p8), 1, %s1486_s26   ;;  %s209_s27 = sand.u32 (!%p1733_p8), 1, %s1345_s13  }
  0x6a   : > { %205 = sbr.rel (%p1733_p8) target bundleno = 1069 (0x42d), region = 32  ;;  %s1581_s22 = sshll.u32 (!%p1733_p8), %s209_s27, 3 }
  0x6b   : > { %s208_s7 = scalar_lea.sflag (!%p1733_p8), [#allocation3], %s207_s23  ;;  %s211_s9 = scalar_lea.vmem (!%p1733_p8), [#allocation2], %s1581_s22 }
  0x6c   : > { %p1734_p5 = scmp.ne.s32.totalorder (!%p1733_p8), %s1727_s30, 0 }
  0x71   : > { %1324 = dma.done.wait (%p1734_p5), %s208_s7, 128  }
  0x72   : > { %1326 = vsyncadd (%p1734_p5), %s208_s7, 4294967168  ;;  %p1735_p0 = scmp.eq.s32.totalorder %s1486_s26, 0 }
  0x74   : > { %1328 = dma.done.wait (%p1735_p0), [#allocation6], 8192   ;;  %p1736_p7 = pmov %p1735_p0 }
  0x75   : > { %s224_s6 = scalar_lea.vmem [#allocation7], %s1581_s22 }
  0x76   : > { %1330 = vsyncadd (%p1736_p7), [#allocation6], 4294959104 }
  0x77   : > { %1332 = dma.done.wait (%p1734_p5), %s208_s7, 128  }
  0x78   : > { %1334 = vsyncadd (%p1734_p5), %s208_s7, 4294967168  ;;  %v1368_v0 = vmov 0.0|0.0   ;;  %vm1369_vm0 = vmmov 0   ;;  %v1370_v1 = vmov 0.0   ;;  %v254_v2 = vld [vmem:[#allocation5] sm:$0xff]  ;;  %v255_v3 = vld [vmem:[#allocation5 + $0x8] sm:$0xff]  ;;  %v340_v63 = vlaneseq }
  0x79   : > { %998 = vmatprep.subr.bf16.mxu0 %v1368_v0  ;;  %890 = vmatprep.mubr.msk.f32.mxu0 %vm1369_vm0, %v1370_v1  ;;  %v256_v4 = vld [vmem:[#allocation5 + $0x10] sm:$0xff]  ;;  %v999_v5 = vpack.c.bf16 %v255_v3, %v254_v2  ;;  %v257_v6 = vld [vmem:[#allocation5 + $0x18] sm:$0xff]  ;;  %v258_v8 = vld [vmem:[#allocation5 + $0x20] sm:$0xff]  ;;  %s787_s26 = sshll.u32 %s1353_s15, 7  ;;  %s251_s30 = scalar_lea.vmem [#allocation8], %s1581_s22 }
  0x7a   : > { %1022 = vmatprep.subr.bf16.mxu1 %v1368_v0  ;;  %925 = vmatprep.mubr.msk.f32.mxu1 %vm1369_vm0, %v1370_v1  ;;  %v1002_v7 = vpack.c.bf16 %v257_v6, %v256_v4  ;;  %v259_v9 = vld [vmem:[#allocation5 + $0x28] sm:$0xff]  ;;  %v352_v10 = vld [vmem:[#allocation5 + $0x80] sm:$0xff]  ;;  %v354_v12 = vld [vmem:[#allocation5 + $0x90] sm:$0xff]  ;;  %v1627_v2 = vshrl.u32 %v340_v63, 7  ;;  %s662_s8 = sshll.u32 %s251_s30, 4  ;;  %s1666_s25 = scalar_lea.hbm %s1718_s3, %s787_s26  ;;  %s1668_s8 = int_to_ptr.vmem [resolvable:$true] %s662_s8 }
  0x7b   : > { %1000 = vmatpush3.bf16.msra.mxu0 %v999_v5  ;;  %v353_v11 = vld [vmem:[#allocation5 + $0x88] sm:$0xff]  ;;  %v355_v13 = vld [vmem:[#allocation5 + $0x98] sm:$0xff]  ;;  %v1005_v14 = vpack.c.bf16 %v259_v9, %v258_v8  ;;  %v260_v16 = vld [vmem:[#allocation5 + $0x30] sm:$0xff]  ;;  %s648_s19 = scalar_lea.sflag [#allocation4], %s209_s27  ;;  %s1271_s29 = scalar_lea.vmem %s1668_s8, 128 }
  0x7c   : > { %1001 = vmatprep.subr.bf16.mxu0 %v1368_v0  ;;  %v1023_v15 = vpack.c.bf16 %v353_v11, %v352_v10  ;;  %v261_v17 = vld [vmem:[#allocation5 + $0x38] sm:$0xff]  ;;  %v1026_v18 = vpack.c.bf16 %v355_v13, %v354_v12  ;;  %v356_v19 = vld [vmem:[#allocation5 + $0xa0] sm:$0xff]  ;;  %v357_v20 = vld [vmem:[#allocation5 + $0xa8] sm:$0xff]  ;;  %v342_v3 = vsub.s32 0, %v1627_v2  ;;  %v347_v5 = vsub.s32 4, %v1627_v2  ;;  %p1272_p9 = scmp.ne.s32.totalorder %s1668_s8, %s1271_s29  ;;  %p1737_p12 = scmp.ne.s32.totalorder %s1728_s28, 0 }
  0x7d   : > { %v1008_v21 = vpack.c.bf16 %v261_v17, %v260_v16  ;;  %v262_v22 = vld [vmem:[#allocation5 + $0x40] sm:$0xff]  ;;  %v263_v23 = vld [vmem:[#allocation5 + $0x48] sm:$0xff]  ;;  %v1029_v24 = vpack.c.bf16 %v357_v20, %v356_v19  ;;  %v358_v25 = vld [vmem:[#allocation5 + $0xb0] sm:$0xff]  ;;  %s1371_s15 = smov [#allocation8]  }
  0x7e   : > { %1024 = vmatpush3.bf16.msra.mxu1 %v1023_v15  ;;  %v359_v26 = vld [vmem:[#allocation5 + $0xb8] sm:$0xff]  ;;  %v1011_v27 = vpack.c.bf16 %v263_v23, %v262_v22  ;;  %v264_v28 = vld [vmem:[#allocation5 + $0x50] sm:$0xff]  ;;  %v266_v32 = vld [vmem:[#allocation5 + $0x60] sm:$0xff]  ;;  %p1273_p13 = pnand %p1272_p9, %p1737_p12  ;;  %s1275_s0 = sshll.u32 %s1371_s15, 4  ;;  %s1276_s0 = int_to_ptr.vmem [resolvable:$false] %s1275_s0 }
  0x7f   : > { %1003 = vmatpush3.bf16.msra.mxu0 %v1002_v7  ;;  %1025 = vmatprep.subr.bf16.mxu1 %v1368_v0  ;;  %v265_v29 = vld [vmem:[#allocation5 + $0x58] sm:$0xff]  ;;  %v1032_v30 = vpack.c.bf16 %v359_v26, %v358_v25  ;;  %v267_v33 = vld [vmem:[#allocation5 + $0x68] sm:$0xff]  ;;  %v268_v35 = vld [vmem:[#allocation5 + $0x70] sm:$0xff]  ;;  %s1277_s5 = scalar_lea.vmem %s1276_s0, 256  ;;  %p1278_p3 = scmp.lt.s32.totalorder %s1668_s8, %s1276_s0 }
  0x80   : > { %1004 = vmatprep.subr.bf16.mxu0 %v1368_v0  ;;  %v1014_v31 = vpack.c.bf16 %v265_v29, %v264_v28  ;;  %v1017_v34 = vpack.c.bf16 %v267_v33, %v266_v32  ;;  %v269_v36 = vld [vmem:[#allocation5 + $0x78] sm:$0xff]  ;;  %v360_v39 = vld [vmem:[#allocation5 + $0xc0] sm:$0xff]  ;;  %v361_v40 = vld [vmem:[#allocation5 + $0xc8] sm:$0xff]  ;;  %p1274_p6 = pneg %p1273_p13  ;;  %p1279_p1 = scmp.lt.s32.totalorder %s1277_s5, %s1271_s29 }
  0x81   : > { %v1020_v37 = vpack.c.bf16 %v269_v36, %v268_v35  ;;  %v253_v38 = vld [vmem:[%s211_s9] sm:$0xff]  ;;  %v1035_v41 = vpack.c.bf16 %v361_v40, %v360_v39  ;;  %v364_v45 = vld [vmem:[#allocation5 + $0xe0] sm:$0xff]  ;;  %v365_v46 = vld [vmem:[#allocation5 + $0xe8] sm:$0xff]  ;;  %v440_v36 = vsub.s32 1, %v1627_v2 }
  0x82   : > { %1027 = vmatpush3.bf16.msra.mxu1 %v1026_v18  ;;  %v362_v42 = vld [vmem:[#allocation5 + $0xd0] sm:$0xff]  ;;  %v363_v43 = vld [vmem:[#allocation5 + $0xd8] sm:$0xff]  ;;  %v1041_v47 = vpack.c.bf16 %v365_v46, %v364_v45  ;;  %v451_v51 = vld [vmem:[#allocation5 + $0x100] sm:$0xff]  ;;  %p1280_p10 = por %p1279_p1, %p1278_p3 }
  0x83   : > { %1006 = vmatpush3.bf16.msra.mxu0 %v1005_v14  ;;  %1028 = vmatprep.subr.bf16.mxu1 %v1368_v0  ;;  %v1038_v44 = vpack.c.bf16 %v363_v43, %v362_v42  ;;  %v366_v48 = vld [vmem:[#allocation5 + $0xf0] sm:$0xff]  ;;  %v367_v49 = vld [vmem:[#allocation5 + $0xf8] sm:$0xff]  ;;  %v452_v52 = vld [vmem:[#allocation5 + $0x108] sm:$0xff] }
  0x84   : > { %1007 = vmatprep.subr.bf16.mxu0 %v1368_v0  ;;  %v1044_v50 = vpack.c.bf16 %v367_v49, %v366_v48  ;;  %v453_v53 = vld [vmem:[#allocation5 + $0x110] sm:$0xff]  ;;  %v1047_v54 = vpack.c.bf16 %v452_v52, %v451_v51  ;;  %v454_v55 = vld [vmem:[#allocation5 + $0x118] sm:$0xff]  ;;  %v455_v57 = vld [vmem:[#allocation5 + $0x120] sm:$0xff]  ;;  %p1281_p2 = pnand %p1280_p10, %p1274_p6 }
  0x85   : > { %v1050_v56 = vpack.c.bf16 %v454_v55, %v453_v53  ;;  %v456_v58 = vld [vmem:[#allocation5 + $0x128] sm:$0xff]  ;;  %v457_v60 = vld [vmem:[#allocation5 + $0x130] sm:$0xff]  ;;  %v458_v61 = vld [vmem:[#allocation5 + $0x138] sm:$0xff] }
  0x86   : > { %1030 = vmatpush3.bf16.msra.mxu1 %v1029_v24  ;;  %v1053_v59 = vpack.c.bf16 %v456_v58, %v455_v57  ;;  %v1056_v62 = vpack.c.bf16 %v458_v61, %v457_v60  ;;  %v1632_v4 = vld [vmem:[%s224_s6] sm:$0xff]  ;;  %v461_v16 = vld [vmem:[#allocation5 + $0x150] sm:$0xff]  ;;  %v462_v17 = vld [vmem:[#allocation5 + $0x158] sm:$0xff]  ;;  %v539_v58 = vsub.s32 2, %v1627_v2 }
  0x87   : > { %1009 = vmatpush3.bf16.msra.mxu0 %v1008_v21  ;;  %1031 = vmatprep.subr.bf16.mxu1 %v1368_v0  ;;  %v343_v6 = vrot.slane %v1632_v4, %v342_v3  ;;  %v348_v7 = vrot.slane %v1632_v4, %v347_v5  ;;  %v459_v13 = vld [vmem:[#allocation5 + $0x140] sm:$0xff]  ;;  %v460_v14 = vld [vmem:[#allocation5 + $0x148] sm:$0xff]  ;;  %v1062_v18 = vpack.c.bf16 %v462_v17, %v461_v16  ;;  %v465_v22 = vld [vmem:[#allocation5 + $0x170] sm:$0xff] }
  0x88   : > { %1010 = vmatprep.subr.bf16.mxu0 %v1368_v0  ;;  %v1059_v15 = vpack.c.bf16 %v460_v14, %v459_v13  ;;  %v463_v19 = vld [vmem:[#allocation5 + $0x160] sm:$0xff]  ;;  %v464_v20 = vld [vmem:[#allocation5 + $0x168] sm:$0xff]  ;;  %v466_v23 = vld [vmem:[#allocation5 + $0x178] sm:$0xff]  ;;  %v540_v60 = vrot.slane %v1632_v4, %v539_v58 }
  0x89   : > { %v1065_v21 = vpack.c.bf16 %v464_v20, %v463_v19  ;;  %v1068_v24 = vpack.c.bf16 %v466_v23, %v465_v22  ;;  %v551_v25 = vld [vmem:[#allocation5 + $0x188] sm:$0xff]  ;;  %v552_v26 = vld [vmem:[#allocation5 + $0x190] sm:$0xff]  ;;  %v553_v28 = vld [vmem:[#allocation5 + $0x198] sm:$0xff] }
  0x8a   : > { %1033 = vmatpush3.bf16.msra.mxu1 %v1032_v30  ;;  %v1074_v29 = vpack.c.bf16 %v553_v28, %v552_v26  ;;  %v554_v30 = vld [vmem:[#allocation5 + $0x1a0] sm:$0xff]  ;;  %v556_v33 = vld [vmem:[#allocation5 + $0x1b0] sm:$0xff]  ;;  %v563_v53 = vld [vmem:[#allocation5 + $0x1e8] sm:$0xff] }
  0x8b   : > { %1012 = vmatpush3.bf16.msra.mxu0 %v1011_v27  ;;  %1034 = vmatprep.subr.bf16.mxu1 %v1368_v0  ;;  %v558_v46 = vld [vmem:[#allocation5 + $0x1c0] sm:$0xff]  ;;  %v560_v49 = vld [vmem:[#allocation5 + $0x1d0] sm:$0xff] }
  0x8c   : > { %1013 = vmatprep.subr.bf16.mxu0 %v1368_v0  ;;  %v562_v52 = vld [vmem:[#allocation5 + $0x1e0] sm:$0xff]  ;;  %v564_v55 = vld [vmem:[#allocation5 + $0x1f0] sm:$0xff] }
  0x8e   : > { %1036 = vmatpush3.bf16.msra.mxu1 %v1035_v41 }
  0x8f   : > { %1015 = vmatpush3.bf16.msra.mxu0 %v1014_v31  ;;  %1037 = vmatprep.subr.bf16.mxu1 %v1368_v0  ;;  %v555_v31 = vld [vmem:[#allocation5 + $0x1a8] sm:$0xff] }
  0x90   : > { %1016 = vmatprep.subr.bf16.mxu0 %v1368_v0  ;;  %v1077_v32 = vpack.c.bf16 %v555_v31, %v554_v30 }
  0x92   : > { %1039 = vmatpush3.bf16.msra.mxu1 %v1038_v44 }
  0x93   : > { %1018 = vmatpush3.bf16.msra.mxu0 %v1017_v34  ;;  %1040 = vmatprep.subr.bf16.mxu1 %v1368_v0  ;;  %v557_v34 = vld [vmem:[#allocation5 + $0x1b8] sm:$0xff] }
  0x94   : > { %1019 = vmatprep.subr.bf16.mxu0 %v1368_v0  ;;  %v1080_v35 = vpack.c.bf16 %v557_v34, %v556_v33 }
  0x96   : > { %1042 = vmatpush3.bf16.msra.mxu1 %v1041_v47  ;;  %v559_v47 = vld [vmem:[#allocation5 + $0x1c8] sm:$0xff] }
  0x97   : > { %1021 = vmatpush3.bf16.msra.mxu0 %v1020_v37  ;;  %1043 = vmatprep.subr.bf16.mxu1 %v1368_v0  ;;  %v445_v37 = vsub.s32 5, %v1627_v2  ;;  %v1083_v48 = vpack.c.bf16 %v559_v47, %v558_v46 }
  0x98   : > { %1046 = vmatprep.subr.bf16.mxu0 %v1368_v0 }
  0x99   : > { %v446_v39 = vrot.slane %v1632_v4, %v445_v37 }
  0x9a   : > { %891 = vmatmul.mubr.f32.vlgmr.msra.gmra.mrb[0].mxu0 %v253_v38  ;;  %1045 = vmatpush3.bf16.msra.mxu1 %v1044_v50  ;;  %v441_v38 = vrot.slane %v1632_v4, %v440_v36  ;;  %v561_v50 = vld [vmem:[#allocation5 + $0x1d8] sm:$0xff] }
  0x9b   : > { %960 = vmatprep.mubr.msk.f32.mxu0 %vm1369_vm0, %v1370_v1  ;;  %1070 = vmatprep.subr.bf16.mxu1 %v1368_v0  ;;  %v1086_v51 = vpack.c.bf16 %v561_v50, %v560_v49 }
  0x9c   : > { %1048 = vmatpush3.bf16.msra.mxu0 %v1047_v54  ;;  %v1089_v54 = vpack.c.bf16 %v563_v53, %v562_v52 }
  0x9d   : > { %1049 = vmatprep.subr.bf16.mxu0 %v1368_v0 }
  0xa0   : > { %1051 = vmatpush3.bf16.msra.mxu0 %v1050_v56  ;;  %v565_v56 = vld [vmem:[#allocation5 + $0x1f8] sm:$0xff] }
  0xa1   : > { %1052 = vmatprep.subr.bf16.mxu0 %v1368_v0  ;;  %v1092_v57 = vpack.c.bf16 %v565_v56, %v564_v55 }
  0xa4   : > { %1054 = vmatpush3.bf16.msra.mxu0 %v1053_v59  ;;  %v544_v59 = vsub.s32 6, %v1627_v2 }
  0xa5   : > { %1055 = vmatprep.subr.bf16.mxu0 %v1368_v0 }
  0xa6   : > { %v545_v61 = vrot.slane %v1632_v4, %v544_v59 }
  0xa8   : > { %1057 = vmatpush3.bf16.msra.mxu0 %v1056_v62 }
  0xa9   : > { %1058 = vmatprep.subr.bf16.mxu0 %v1368_v0 }
  0xac   : > { %1060 = vmatpush3.bf16.msra.mxu0 %v1059_v15 }
  0xad   : > { %1061 = vmatprep.subr.bf16.mxu0 %v1368_v0 }
  0xb0   : > { %1063 = vmatpush3.bf16.msra.mxu0 %v1062_v18 }
  0xb1   : > { %1064 = vmatprep.subr.bf16.mxu0 %v1368_v0 }
  0xb4   : > { %1066 = vmatpush3.bf16.msra.mxu0 %v1065_v21 }
  0xb5   : > { %1067 = vmatprep.subr.bf16.mxu0 %v1368_v0 }
  0xb8   : > { %1069 = vmatpush3.bf16.msra.mxu0 %v1068_v24 }
 0x16d   : > { %v336_v8 = vpop.f32.mrb[0].mxu0 }
 0x16e   : > { %v344_v9 = vmul.f32 %v343_v6, %v336_v8  ;;  %v892_v10 = vpop.f32.mrb[1].mxu0  ;;  %v643_v8 = vsub.s32 7, %v1627_v2 }
 0x170   : > { %v349_v11 = vadd.f32 %v348_v7, %v344_v9  ;;  %v644_v10 = vrot.slane %v1632_v4, %v643_v8 }
 0x172   : > { %1177 = vtanh.f32 %v349_v11 }
 0x17c   : > { %v1178_v12 = vpop.eup %1177 }
 0x17d   : > { %926 = vmatmul.mubr.f32.vlgmr.msra.gmra.mrb[0].mxu1 %v1178_v12 }
 0x17e   : > { %995 = vmatprep.mubr.msk.f32.mxu1 %vm1369_vm0, %v1370_v1  ;;  %v550_v1 = vld [vmem:[#allocation5 + $0x180] sm:$0xff] }
 0x17f   : > { %v1071_v27 = vpack.c.bf16 %v551_v25, %v550_v1 }
 0x181   : > { %1072 = vmatpush3.bf16.msra.mxu1 %v1071_v27 }
 0x182   : > { %1073 = vmatprep.subr.bf16.mxu1 %v1368_v0 }
 0x185   : > { %1075 = vmatpush3.bf16.msra.mxu1 %v1074_v29 }
 0x186   : > { %1076 = vmatprep.subr.bf16.mxu1 %v1368_v0 }
 0x189   : > { %1078 = vmatpush3.bf16.msra.mxu1 %v1077_v32 }
 0x18a   : > { %1079 = vmatprep.subr.bf16.mxu1 %v1368_v0 }
 0x18d   : > { %1081 = vmatpush3.bf16.msra.mxu1 %v1080_v35 }
 0x18e   : > { %1082 = vmatprep.subr.bf16.mxu1 %v1368_v0 }
 0x191   : > { %1084 = vmatpush3.bf16.msra.mxu1 %v1083_v48 }
 0x192   : > { %1085 = vmatprep.subr.bf16.mxu1 %v1368_v0 }
 0x195   : > { %1087 = vmatpush3.bf16.msra.mxu1 %v1086_v51 }
 0x196   : > { %1088 = vmatprep.subr.bf16.mxu1 %v1368_v0 }
 0x199   : > { %1090 = vmatpush3.bf16.msra.mxu1 %v1089_v54 }
 0x19a   : > { %1091 = vmatprep.subr.bf16.mxu1 %v1368_v0  ;;  %v638_v0 = vsub.s32 3, %v1627_v2 }
 0x19c   : > { %v639_v9 = vrot.slane %v1632_v4, %v638_v0 }
 0x19d   : > { %1093 = vmatpush3.bf16.msra.mxu1 %v1092_v57 }
 0x250   : > { %v434_v40 = vpop.f32.mrb[0].mxu1 }
 0x251   : > { %v442_v41 = vmul.f32 %v441_v38, %v434_v40  ;;  %v927_v42 = vpop.f32.mrb[1].mxu1 }
 0x253   : > { %v447_v43 = vadd.f32 %v446_v39, %v442_v41 }
 0x255   : > { %1179 = vtanh.f32 %v447_v43 }
 0x25f   : > { %v1180_v44 = vpop.eup %1179 }
 0x260   : > { %v449_v45 = vadd.f32 %v1180_v44, %v1178_v12 }
 0x262   : > { %961 = vmatmul.mubr.f32.vlgmr.msra.gmra.mrb[2].mxu0 %v449_v45 }
 0x335   : > { %v533_v62 = vpop.f32.mrb[2].mxu0 }
 0x336   : > { %v541_v63 = vmul.f32 %v540_v60, %v533_v62  ;;  %v962_v3 = vpop.f32.mrb[3].mxu0 }
 0x338   : > { %v546_v5 = vadd.f32 %v545_v61, %v541_v63 }
 0x33a   : > { %1181 = vtanh.f32 %v546_v5 }
 0x344   : > { %v1182_v6 = vpop.eup %1181 }
 0x345   : > { %v548_v7 = vadd.f32 %v1182_v6, %v449_v45 }
 0x347   : > { %996 = vmatmul.mubr.f32.vlgmr.msra.gmra.mrb[2].mxu1 %v548_v7 }
 0x41a   : > { %v632_v11 = vpop.f32.mrb[2].mxu1 }
 0x41b   : > { %v640_v12 = vmul.f32 %v639_v9, %v632_v11  ;;  %v997_v13 = vpop.f32.mrb[3].mxu1 }
 0x41d   : > { %v645_v14 = vadd.f32 %v644_v10, %v640_v12 }
 0x41f   : > { %646 = vst [vmem:[%s251_s30] sm:$0xff] %v645_v14 }
 0x420   : > { %1284 = shalt.err (!%p1281_p2)
}
 0x421   : > { %s1285_s11 = scalar_lea.hbm %s1666_s25, 128  ;;  %s1289_s27 = scalar_lea.hbm %s1718_s3, 512 }
 0x422   : > { %p1286_p4 = scmp.ne.s32.totalorder %s1666_s25, %s1285_s11  ;;  %p1290_p5 = scmp.lt.u32.totalorder %s1666_s25, %s1718_s3 }
 0x423   : > { %p1291_p0 = scmp.lt.u32.totalorder %s1289_s27, %s1285_s11  ;;  %p1293_p9 = scmp.lt.u32.totalorder %s1285_s11, %s1666_s25 }
 0x424   : > { %p1287_p11 = pnand %p1286_p4, %p1737_p12 }
 0x425   : > { %p1292_p7 = por %p1291_p0, %p1290_p5 }
 0x426   : > { %p1288_p8 = pneg %p1287_p11 }
 0x427   : > { %p1294_p13 = por %p1293_p9, %p1292_p7 }
 0x429   : > { %p1295_p6 = pnand %p1294_p13, %p1288_p8 }
 0x42b   : > { %1298 = shalt.err (!%p1295_p6)
}
 0x42c   : > { %1102 = dma.vmem_to_hbm [thread:$0]  (%p1737_p12), %s1668_s8, 128, %s1666_s25, %s648_s19  }
 0x42d PF: > { %p1122_p3 = scmp.ge.s32.totalorder %s1361_s17, 2  ;;  %s674_s9 = sand.u32 1, %s1341_s12  }
 0x42e   : > { %p1738_p1 = scmp.ne.s32.totalorder %s1729_s4, 0  ;;  %s675_s6 = scalar_lea.sflag [#allocation4], %s674_s9 }
 0x430   : > { %p1116_p10 = pnand %p1122_p3, %p1738_p1 }
 0x432   : > { %1336 = dma.done.wait (!%p1116_p10), %s675_s6, 128  }
 0x433   : > { %1338 = vsyncadd (!%p1116_p10), %s675_s6, 4294967168  ;;  %s20_s17 = sadd.s32 1, %s1361_s17   ;;  %s1739_s12 = smov %s1345_s13 }
 0x434   : > { %p17_p2 = scmp.ge.s32.totalorder %s20_s17, 6   ;;  %s1740_s13 = smov %s1349_s14 }
 0x435   : > { %s1741_s14 = smov %s1439_s24  ;;  %s1742_s15 = smov %s1357_s16 }
 0x436   : > { %s1743_s16 = smov %s1745_s18  ;;  %19 = sbr.rel (!%p17_p2) target bundleno = 9 (0x9), region = 95 }
 0x43d   :  { %680 = vsyncpa [#allocation3], 1 }
 0x43e   :  { %682 = vsyncpa [#allocation3 + $0x1], 1 }
 0x43f   :  { %683 = vsyncpa [#allocation6], 1 }
 0x440   :  { %684 = vsyncpa [#allocation4], 1 }
 0x441   :  { %686 = vsyncpa [#allocation4 + $0x1], 1 }

</bundles_post_ra>
